<compile_context>
chip_gen: v7x
topology: tpu7x:2x2x1
jax: 0.10.0
libtpu: 0.0.40
codegen_flags: <defaults>
</compile_context>

<pallas_src>
import functools

import jax
import jax.numpy as jnp
from jax.experimental import pallas as pl
from jax.experimental.pallas import tpu as pltpu


def _round_up(x, m):
    return ((x + m - 1) // m) * m


def _vmem_capacity_bytes():
    """Per-TensorCore VMEM capacity, with a conservative fallback."""
    try:
        info = pltpu.get_tpu_info()
        cap = getattr(info, "vmem_capacity_bytes", None)
        if cap:
            return int(cap)
    except Exception:
        pass
    return 64 * 2**20  # v7x-sized conservative default


def _lightgcn_kernel(a_hbm_ref, x_ref, out_ref, a_vmem_ref, dma_sem, *, n_layers):
    """Multi-layer lightGCN propagation + layer mean for one column tile.

    a_hbm_ref:  (NP, NP)  bf16 normalized adjacency, resident in HBM (pl.ANY)
    x_ref:      (NP, CT)  bf16 column tile of the layer-0 embedding table (VMEM)
    out_ref:    (NP, CT)  f32  column tile of mean(emb0, ..., embL)        (VMEM)
    a_vmem_ref: (NP, NP)  bf16 single-buffered VMEM scratch for A
    dma_sem:    (1,)      DMA completion semaphore
    """
    # One-time copy of A.  Scratch persists across grid iterations and the
    # grid axis is 'arbitrary' (serial on one core), so steps j>0 reuse it.
    @pl.when(pl.program_id(0) == 0)
    def _():
        cp = pltpu.make_async_copy(a_hbm_ref, a_vmem_ref, dma_sem.at[0])
        cp.start()
        cp.wait()

    a = a_vmem_ref[...]                         # bf16 (NP, NP)
    emb = x_ref[...]                            # bf16 (NP, CT), layer-0 MXU operand
    out_ref[...] = emb.astype(jnp.float32)      # f32 running sum lives in out_ref

    for _ in range(n_layers):                   # small static trip count, unrolled
        nxt = jnp.dot(a, emb, preferred_element_type=jnp.float32)   # MXU, f32 out
        out_ref[...] += nxt
        emb = nxt.astype(jnp.bfloat16)

    out_ref[...] = out_ref[...] * (1.0 / float(n_layers + 1))


def recsys_gnn_forward(emb0, adj_norm, n_layers, col_tile=None):
    """Returns (emb0, out) exactly like RecSysGNN.forward for model='lightGCN'."""
    N, D = emb0.shape
    NP = _round_up(N, 128)                      # MXU / (8,128) aligned node count

    vmem_cap = _vmem_capacity_bytes()
    vmem_budget = int(vmem_cap * 0.85)          # headroom for compiler scratch

    a_bytes = NP * NP * 2                       # single-buffered bf16 resident A

    def _footprint(ct):
        io = 2 * (NP * ct * 2) + 2 * (NP * ct * 4)   # x bf16 dbl-buf + out f32 dbl-buf
        tmp = 2 * NP * ct * 4                        # f32 product + bf16 recast slack
        return a_bytes + io + tmp

    if _footprint(128) > vmem_budget:
        raise ValueError(
            f"Resident-adjacency design needs {_footprint(128) / 2**20:.1f} MiB VMEM "
            f"for NP={NP}, exceeding the ~{vmem_budget / 2**20:.0f} MiB budget on this "
            "chip. TODO(synk): stream (TM, TK) tiles of A over a K-reduction grid "
            "axis, or use a sparse SpMM with scalar-prefetched row offsets."
        )

    if col_tile is None:
        col_tile = 128
        d_cap = _round_up(D, 128)
        for ct in (512, 256):                   # prefer MXU-width (>=256) tiles
            if ct <= d_cap and _footprint(ct) <= vmem_budget:
                col_tile = ct
                break
    assert col_tile % 128 == 0, "col_tile must be lane-aligned (multiple of 128)"

    DP = _round_up(D, col_tile)                 # lane-dense embedding width
    n_col_tiles = DP // col_tile

    # Zero-pad: padded nodes have zero rows/cols in A and zero embeddings, so
    # they neither send nor receive messages; slice them away at the end.
    emb0_p = jnp.pad(emb0, ((0, NP - N), (0, DP - D))).astype(jnp.bfloat16)
    adj_p = jnp.pad(adj_norm, ((0, NP - N), (0, NP - N))).astype(jnp.bfloat16)

    # Tight VMEM request (no double-counting), capped per generation.
    vmem_limit = int(min(max(_footprint(col_tile) + (2 << 20), 16 << 20), vmem_budget))

    cost = pl.CostEstimate(
        flops=2 * n_layers * NP * NP * DP,
        transcendentals=0,
        bytes_accessed=a_bytes + NP * DP * 2 + NP * DP * 4,   # A once + x in + out
    )

    out_p = pl.pallas_call(
        functools.partial(_lightgcn_kernel, n_layers=n_layers),
        out_shape=jax.ShapeDtypeStruct((NP, DP), jnp.float32),
        grid_spec=pltpu.PrefetchScalarGridSpec(
            num_scalar_prefetch=0,
            grid=(n_col_tiles,),
            in_specs=[
                pl.BlockSpec(memory_space=pl.ANY),                 # A stays in HBM
                pl.BlockSpec((NP, col_tile), lambda j: (0, j)),    # emb0 column tile
            ],
            out_specs=pl.BlockSpec((NP, col_tile), lambda j: (0, j)),
            scratch_shapes=[
                pltpu.VMEM((NP, NP), jnp.bfloat16),                # single-buffered A
                pltpu.SemaphoreType.DMA((1,)),
            ],
        ),
        compiler_params=pltpu.CompilerParams(
            # 'arbitrary' is required: the A scratch is filled only at j == 0,
            # so the column axis must run serially on a single core.
            dimension_semantics=("arbitrary",),
            vmem_limit_bytes=vmem_limit,
        ),
        cost_estimate=cost,
    )(adj_p, emb0_p)

    return emb0, out_p[:N, :D]


def _build_graph(key, n_users, n_items, n_interactions):
    """Random bipartite user-item graph, edges in both directions (as in LightGCN)."""
    ku, ki, ka = jax.random.split(key, 3)
    u = jax.random.randint(ku, (n_interactions,), 0, n_users)
    i = jax.random.randint(ki, (n_interactions,), 0, n_items) + n_users
    frm = jnp.concatenate([u, i])
    to = jnp.concatenate([i, u])
    edge_attrs = jax.random.uniform(ka, (frm.shape[0],), jnp.float32)  # unused by lightGCN
    return frm, to, edge_attrs


def _normalized_adjacency(frm, to, n_nodes):
    """A[dst, src] = deg(dst)^-1/2 * deg(src)^-1/2 per edge (sum-aggregated)."""
    deg = jnp.zeros((n_nodes,), jnp.float32).at[to].add(1.0)
    dis = jnp.where(deg > 0, jax.lax.rsqrt(deg), 0.0)  # inf -> 0 as in the torch code
    norm = dis[frm] * dis[to]
    adj = jnp.zeros((n_nodes, n_nodes), jnp.float32).at[to, frm].add(norm)
    return adj, norm


def _reference_forward(emb0, frm, to, norm, n_layers):
    """Pure-JAX gather/scatter reference matching MessagePassing(aggr='add')."""
    emb = emb0
    embs = [emb0]
    for _ in range(n_layers):
        msgs = norm[:, None] * emb[frm]
        emb = jnp.zeros_like(emb).at[to].add(msgs)
        embs.append(emb)
    out = jnp.mean(jnp.stack(embs, axis=0), axis=0)
    return emb0, out


if __name__ == "__main__":
    # Small, deterministic configuration (padded N=120 -> 128, D=256).
    n_users, n_items = 50, 70
    n_nodes = n_users + n_items          # 120
    emb_dim = 256                        # one or two lane-dense column tiles
    n_layers = 3
    n_interactions = 400

    key = jax.random.PRNGKey(0)
    k_emb, k_graph = jax.random.split(key)

    # nn.init.normal_(embedding.weight, std=0.1)  (lightGCN branch of init_parameters)
    emb0 = 0.1 * jax.random.normal(k_emb, (n_nodes, emb_dim), jnp.float32)

    frm, to, edge_attrs = _build_graph(k_graph, n_users, n_items, n_interactions)
    adj_norm, norm = _normalized_adjacency(frm, to, n_nodes)

    emb0_out, out = recsys_gnn_forward(emb0, adj_norm, n_layers)
    out = jax.block_until_ready(out)

    # Correctness check against the gather/scatter reference.
    ref_emb0, ref_out = _reference_forward(emb0, frm, to, norm, n_layers)
    assert out.shape == (n_nodes, emb_dim) and out.dtype == jnp.float32
    # bf16 matmul operands / bf16 emb0 tiles with f32 accumulation -> ~1e-2 agreement.
    assert jnp.allclose(out, ref_out, atol=2e-2, rtol=2e-2)
    assert jnp.array_equal(emb0_out, ref_emb0)

    print("KERNEL_OK")
</pallas_src>

<mosaic_0001>
module attributes {stable_mosaic.version = 11 : i64} {
  func.func @_lightgcn_kernel(%arg0: i32, %arg1: memref<128x128xbf16, #tpu.memory_space<any>>, %arg2: memref<128x256xbf16, #tpu.memory_space<vmem>>, %arg3: memref<128x256xf32, #tpu.memory_space<vmem>>, %arg4: memref<128x128xbf16, #tpu.memory_space<vmem>>, %arg5: memref<1x!tpu.dma_semaphore, #tpu.memory_space<semaphore_mem>>) attributes {dimension_semantics = [#tpu.dimension_semantics<arbitrary>], iteration_bounds = array<i64: 1>, scalar_prefetch = 0 : i64, scratch_operands = 2 : i64, tpu.core_type = #tpu.core_type<tc>, window_params = [{}, {transform_indices = @transform_1, window_bounds = array<i64: 128, 256>}, {transform_indices = @transform_2, window_bounds = array<i64: 128, 256>}]} {
    %c0_i32 = arith.constant 0 : i32
    %0 = arith.cmpi eq, %arg0, %c0_i32 : i32
    %1 = arith.extui %0 : i1 to i32
    %c0_i32_0 = arith.constant 0 : i32
    %2 = arith.cmpi ne, %1, %c0_i32_0 : i32
    scf.if %2 {
      %c0_i32_25 = arith.constant 0 : i32
      %25 = tpu.memref_slice %arg5[%c0_i32_25] : memref<1x!tpu.dma_semaphore, #tpu.memory_space<semaphore_mem>> -> memref<1x!tpu.dma_semaphore, #tpu.memory_space<semaphore_mem>>
      %26 = tpu.memref_squeeze %25 : memref<1x!tpu.dma_semaphore, #tpu.memory_space<semaphore_mem>> -> memref<!tpu.dma_semaphore, #tpu.memory_space<semaphore_mem>>
      tpu.enqueue_dma source(%arg1 : memref<128x128xbf16, #tpu.memory_space<any>>) target(%arg4 : memref<128x128xbf16, #tpu.memory_space<vmem>>) target_semaphore(%26 : memref<!tpu.dma_semaphore, #tpu.memory_space<semaphore_mem>>)
      %c0_i32_26 = arith.constant 0 : i32
      %27 = tpu.memref_slice %arg5[%c0_i32_26] : memref<1x!tpu.dma_semaphore, #tpu.memory_space<semaphore_mem>> -> memref<1x!tpu.dma_semaphore, #tpu.memory_space<semaphore_mem>>
      %28 = tpu.memref_squeeze %27 : memref<1x!tpu.dma_semaphore, #tpu.memory_space<semaphore_mem>> -> memref<!tpu.dma_semaphore, #tpu.memory_space<semaphore_mem>>
      tpu.wait_dma2 semaphore(%28 : memref<!tpu.dma_semaphore, #tpu.memory_space<semaphore_mem>>) src(%arg1 : memref<128x128xbf16, #tpu.memory_space<any>>) dst(%arg4 : memref<128x128xbf16, #tpu.memory_space<vmem>>)
    } else {
    }
    %c0 = arith.constant 0 : index
    %c0_1 = arith.constant 0 : index
    %3 = vector.load %arg4[%c0, %c0_1] : memref<128x128xbf16, #tpu.memory_space<vmem>>, vector<128x128xbf16>
    %c0_2 = arith.constant 0 : index
    %c0_3 = arith.constant 0 : index
    %4 = vector.load %arg2[%c0_2, %c0_3] : memref<128x256xbf16, #tpu.memory_space<vmem>>, vector<128x256xbf16>
    %5 = arith.extf %4 : vector<128x256xbf16> to vector<128x256xf32>
    %c0_4 = arith.constant 0 : index
    %c0_5 = arith.constant 0 : index
    %6 = vector.load %arg3[%c0_4, %c0_5] : memref<128x256xf32, #tpu.memory_space<vmem>>, vector<128x256xf32>
    tpu.vector_store %arg3[%c0_4, %c0_5], %5 {strides = array<i32>} : memref<128x256xf32, #tpu.memory_space<vmem>>, vector<128x256xf32>,
    %cst = arith.constant dense<0.000000e+00> : vector<128x256xf32>
    %7 = tpu.matmul %3, %4, %cst {dimension_numbers = #tpu.dot_dimension_numbers<[1], [0], [0], [1], [0, 0, 1, 1], [], []>} : vector<128x128xbf16>, vector<128x256xbf16>, vector<128x256xf32> -> vector<128x256xf32>
    %c0_6 = arith.constant 0 : index
    %c0_7 = arith.constant 0 : index
    %8 = vector.load %arg3[%c0_6, %c0_7] : memref<128x256xf32, #tpu.memory_space<vmem>>, vector<128x256xf32>
    %9 = arith.addf %8, %7 : vector<128x256xf32>
    %c0_8 = arith.constant 0 : index
    %c0_9 = arith.constant 0 : index
    %10 = vector.load %arg3[%c0_8, %c0_9] : memref<128x256xf32, #tpu.memory_space<vmem>>, vector<128x256xf32>
    tpu.vector_store %arg3[%c0_8, %c0_9], %9 {strides = array<i32>} : memref<128x256xf32, #tpu.memory_space<vmem>>, vector<128x256xf32>,
    %11 = arith.truncf %7 : vector<128x256xf32> to vector<128x256xbf16>
    %cst_10 = arith.constant dense<0.000000e+00> : vector<128x256xf32>
    %12 = tpu.matmul %3, %11, %cst_10 {dimension_numbers = #tpu.dot_dimension_numbers<[1], [0], [0], [1], [0, 0, 1, 1], [], []>} : vector<128x128xbf16>, vector<128x256xbf16>, vector<128x256xf32> -> vector<128x256xf32>
    %c0_11 = arith.constant 0 : index
    %c0_12 = arith.constant 0 : index
    %13 = vector.load %arg3[%c0_11, %c0_12] : memref<128x256xf32, #tpu.memory_space<vmem>>, vector<128x256xf32>
    %14 = arith.addf %13, %12 : vector<128x256xf32>
    %c0_13 = arith.constant 0 : index
    %c0_14 = arith.constant 0 : index
    %15 = vector.load %arg3[%c0_13, %c0_14] : memref<128x256xf32, #tpu.memory_space<vmem>>, vector<128x256xf32>
    tpu.vector_store %arg3[%c0_13, %c0_14], %14 {strides = array<i32>} : memref<128x256xf32, #tpu.memory_space<vmem>>, vector<128x256xf32>,
    %16 = arith.truncf %12 : vector<128x256xf32> to vector<128x256xbf16>
    %cst_15 = arith.constant dense<0.000000e+00> : vector<128x256xf32>
    %17 = tpu.matmul %3, %16, %cst_15 {dimension_numbers = #tpu.dot_dimension_numbers<[1], [0], [0], [1], [0, 0, 1, 1], [], []>} : vector<128x128xbf16>, vector<128x256xbf16>, vector<128x256xf32> -> vector<128x256xf32>
    %c0_16 = arith.constant 0 : index
    %c0_17 = arith.constant 0 : index
    %18 = vector.load %arg3[%c0_16, %c0_17] : memref<128x256xf32, #tpu.memory_space<vmem>>, vector<128x256xf32>
    %19 = arith.addf %18, %17 : vector<128x256xf32>
    %c0_18 = arith.constant 0 : index
    %c0_19 = arith.constant 0 : index
    %20 = vector.load %arg3[%c0_18, %c0_19] : memref<128x256xf32, #tpu.memory_space<vmem>>, vector<128x256xf32>
    tpu.vector_store %arg3[%c0_18, %c0_19], %19 {strides = array<i32>} : memref<128x256xf32, #tpu.memory_space<vmem>>, vector<128x256xf32>,
    %c0_20 = arith.constant 0 : index
    %c0_21 = arith.constant 0 : index
    %21 = vector.load %arg3[%c0_20, %c0_21] : memref<128x256xf32, #tpu.memory_space<vmem>>, vector<128x256xf32>
    %cst_22 = arith.constant 2.500000e-01 : f32
    %22 = vector.broadcast %cst_22 : f32 to vector<128x256xf32>
    %23 = arith.mulf %21, %22 : vector<128x256xf32>
    %c0_23 = arith.constant 0 : index
    %c0_24 = arith.constant 0 : index
    %24 = vector.load %arg3[%c0_23, %c0_24] : memref<128x256xf32, #tpu.memory_space<vmem>>, vector<128x256xf32>
    tpu.vector_store %arg3[%c0_23, %c0_24], %23 {strides = array<i32>} : memref<128x256xf32, #tpu.memory_space<vmem>>, vector<128x256xf32>,
    return
  }
  func.func @transform_1(%arg0: i32) -> (i32, i32) {
    %c0_i32 = arith.constant 0 : i32
    %c0_i32_0 = arith.constant 0 : i32
    return %c0_i32, %arg0 : i32, i32
  }
  func.func @transform_2(%arg0: i32) -> (i32, i32) {
    %c0_i32 = arith.constant 0 : i32
    %c0_i32_0 = arith.constant 0 : i32
    return %c0_i32, %arg0 : i32, i32
  }
}

</mosaic_0001>

<bundles_post_ra>
// kernel: tpu_custom_call.1
= control target key start
LH: loop header
LB: loop body
LE: loop exit
PB: predicated region body
PF: predicated region fallthrough
CT: control target
= control target key end

     0   :  { %7 = vsyncpa [#allocation5], 0  ;;  %s1574_s0 = inlined_call_operand.hbm [shape: bf16[128,128], index: 0, kind: input, shape index: {}]   ;;  %s1575_s1 = inlined_call_operand.hbm [shape: bf16[128,256], index: 1, kind: input, shape index: {}]   ;;  %s1576_s2 = inlined_call_operand.hbm [shape: f32[128,256], index: 2, kind: output, shape index: {}]  }
   0x1   :  { %8 = vsyncpa [#allocation6], 0  ;;  %s1119_s9 = smov [#allocation4]   ;;  %s1047_s13 = scalar_lea.hbm %s1575_s1, 2048 }
   0x2   :  { %s14_s10 = sshll.u32 %s1119_s9, 4  ;;  %p1048_p0 = scmp.ne.s32.totalorder %s1575_s1, %s1047_s13  ;;  %s15_s10 = int_to_ptr.vmem [resolvable:$true] %s14_s10 }
   0x3   :  { %p1051_p1 = scmp.lt.u32.totalorder %s1047_s13, %s1575_s1 }
   0x5   :  { %p1053_p2 = pnand %p1051_p1, %p1048_p0 }
   0x7   :  { %1056 = shalt.err (!%p1053_p2)
}
   0x8   :  { %s1057_s18 = scalar_lea.vmem %s15_s10, 2048  ;;  %p1062_p4 = scmp.lt.s32.totalorder %s15_s10, %s15_s10 }
   0x9   :  { %p1058_p3 = scmp.ne.s32.totalorder %s15_s10, %s1057_s18  ;;  %p1063_p5 = scmp.lt.s32.totalorder %s1057_s18, %s1057_s18 }
   0xb   :  { %p1064_p6 = por %p1063_p5, %p1062_p4 }
   0xd   :  { %p1065_p7 = pnand %p1064_p6, %p1058_p3 }
   0xf   :  { %1068 = shalt.err (!%p1065_p7)
}
  0x10   :  { %s1120_s19 = smov 128   ;;  %s1121_s20 = smov 8  }
  0x11   :  { %20 = dma.hbm_to_vmem [thread:$0]  %s1575_s1, 2048, %s15_s10, [#allocation5], %s1120_s19, %s1120_s19, %s1121_s20  }
  0x12   :  { %1113 = dma.done.wait [#allocation5], 2048  }
  0x13   :  { %1114 = vsyncadd [#allocation5], 4294965248  ;;  %s1122_s23 = smov [#allocation2]   ;;  %s1069_s27 = scalar_lea.hbm %s1574_s0, 1024 }
  0x14   :  { %s36_s24 = sshll.u32 %s1122_s23, 4  ;;  %p1070_p8 = scmp.ne.s32.totalorder %s1574_s0, %s1069_s27  ;;  %s37_s24 = int_to_ptr.vmem [resolvable:$true] %s36_s24 }
  0x15   :  { %p1073_p9 = scmp.lt.u32.totalorder %s1069_s27, %s1574_s0 }
  0x17   :  { %p1075_p10 = pnand %p1073_p9, %p1070_p8 }
  0x19   :  { %1078 = shalt.err (!%p1075_p10)  }
  0x1a   :  { %s1079_s1 = scalar_lea.vmem %s37_s24, 1024  ;;  %p1084_p12 = scmp.lt.s32.totalorder %s37_s24, %s37_s24 }
  0x1b   :  { %p1080_p11 = scmp.ne.s32.totalorder %s37_s24, %s1079_s1  ;;  %p1085_p13 = scmp.lt.s32.totalorder %s1079_s1, %s1079_s1 }
  0x1d   :  { %p1086_p0 = por %p1085_p13, %p1084_p12 }
  0x1f   :  { %p1087_p1 = pnand %p1086_p0, %p1080_p11 }
  0x21   :  { %1090 = shalt.err (!%p1087_p1)  }
  0x22   :  { %39 = dma.hbm_to_vmem [thread:$0]  %s1574_s0, 1024, %s37_s24, [#allocation3] }
  0x23   :  { %1115 = dma.done.wait [#allocation3], 1024 }
  0x24   :  { %1116 = vsyncadd [#allocation3], 4294966272  ;;  %v1577_v0 = vmov 0   ;;  %v1168_v1 = vld [vmem:[#allocation4] sm:$0xff]  ;;  %v1170_v2 = vld [vmem:[#allocation4 + $0x8] sm:$0xff]  ;;  %s1124_s0 = smov [#allocation7]  }
  0x25   :  { %244 = vmatprep.mubr.bf16.mxu0 %v1577_v0  ;;  %284 = vmatprep.mubr.bf16.mxu1 %v1577_v0  ;;  %v1172_v3 = vld [vmem:[#allocation4 + $0x10] sm:$0xff]  ;;  %v1174_v4 = vld [vmem:[#allocation4 + $0x18] sm:$0xff]  ;;  %v991_v5 = vcombine.high %v1168_v1, %v1170_v2  ;;  %v990_v6 = vcombine.low %v1168_v1, %v1170_v2  ;;  %v1182_v8 = vld [vmem:[#allocation4 + $0x20] sm:$0xff]  ;;  %v68_v41 = vunpack.c.l.bf16 %v1168_v1  ;;  %v69_v43 = vunpack.c.h.bf16 %v1168_v1  ;;  %s972_s6 = sshll.u32 %s1124_s0, 4  ;;  %s973_s6 = int_to_ptr.vmem [resolvable:$true] %s972_s6 }
  0x26   :  { %v993_v7 = vcombine.high %v1172_v3, %v1174_v4  ;;  %v1184_v9 = vld [vmem:[#allocation4 + $0x28] sm:$0xff]  ;;  %v992_v10 = vcombine.low %v1172_v3, %v1174_v4  ;;  %v1190_v12 = vld [vmem:[#allocation4 + $0x30] sm:$0xff]  ;;  %v1192_v13 = vld [vmem:[#allocation4 + $0x38] sm:$0xff]  ;;  %v70_v45 = vunpack.c.l.bf16 %v1170_v2  ;;  %v71_v47 = vunpack.c.h.bf16 %v1170_v2  ;;  %s1091_s7 = scalar_lea.vmem %s973_s6, 4096  ;;  %p1096_p3 = scmp.lt.s32.totalorder %s973_s6, %s973_s6 }
  0x27   :  { %212 = vmatprep.subr.bf16.mxu0 %v991_v5  ;;  %1007 = vmatprep.subr.bf16.mxu1 %v991_v5  ;;  %v995_v11 = vcombine.high %v1182_v8, %v1184_v9  ;;  %v994_v14 = vcombine.low %v1182_v8, %v1184_v9  ;;  %v997_v15 = vcombine.high %v1190_v12, %v1192_v13  ;;  %v1198_v16 = vld [vmem:[#allocation4 + $0x40] sm:$0xff]  ;;  %v1200_v17 = vld [vmem:[#allocation4 + $0x48] sm:$0xff]  ;;  %v1206_v20 = vld [vmem:[#allocation4 + $0x50] sm:$0xff]  ;;  %v81_v63 = vunpack.c.h.bf16 %v1190_v12  ;;  %p1092_p2 = scmp.ne.s32.totalorder %s973_s6, %s1091_s7  ;;  %p1097_p4 = scmp.lt.s32.totalorder %s1091_s7, %s1091_s7 }
  0x28   :  { %213 = vmatpush1.bf16.msra.mxu0 %v990_v6  ;;  %1015 = vmatpush1.bf16.msra.mxu1 %v990_v6  ;;  %v996_v18 = vcombine.low %v1190_v12, %v1192_v13  ;;  %v999_v19 = vcombine.high %v1198_v16, %v1200_v17  ;;  %v1208_v21 = vld [vmem:[#allocation4 + $0x58] sm:$0xff]  ;;  %v998_v22 = vcombine.low %v1198_v16, %v1200_v17  ;;  %v1214_v24 = vld [vmem:[#allocation4 + $0x60] sm:$0xff]  ;;  %v1216_v25 = vld [vmem:[#allocation4 + $0x68] sm:$0xff]  ;;  %v84_v42 = vunpack.c.l.bf16 %v1198_v16 }
  0x29   :  { %214 = vmatprep.subr.bf16.mxu0 %v993_v7  ;;  %1008 = vmatprep.subr.bf16.mxu1 %v993_v7  ;;  %v1001_v23 = vcombine.high %v1206_v20, %v1208_v21  ;;  %v1000_v26 = vcombine.low %v1206_v20, %v1208_v21  ;;  %v1003_v27 = vcombine.high %v1214_v24, %v1216_v25  ;;  %v1222_v28 = vld [vmem:[#allocation4 + $0x70] sm:$0xff]  ;;  %v1224_v29 = vld [vmem:[#allocation4 + $0x78] sm:$0xff]  ;;  %v1232_v33 = vld [vmem:[#allocation2] sm:$0xff]  ;;  %v85_v44 = vunpack.c.h.bf16 %v1198_v16  ;;  %p1098_p5 = por %p1097_p4, %p1096_p3 }
  0x2a   :  { %v1002_v30 = vcombine.low %v1214_v24, %v1216_v25  ;;  %v1005_v31 = vcombine.high %v1222_v28, %v1224_v29  ;;  %v1004_v32 = vcombine.low %v1222_v28, %v1224_v29  ;;  %v1234_v34 = vld [vmem:[#allocation2 + $0x20] sm:$0xff]  ;;  %v1240_v35 = vld [vmem:[#allocation2 + $0x8] sm:$0xff]  ;;  %v1248_v37 = vld [vmem:[#allocation2 + $0x10] sm:$0xff]  ;;  %v86_v46 = vunpack.c.l.bf16 %v1200_v17 }
  0x2b   :  { %v1242_v36 = vld [vmem:[#allocation2 + $0x28] sm:$0xff]  ;;  %v1250_v38 = vld [vmem:[#allocation2 + $0x30] sm:$0xff]  ;;  %v1256_v39 = vld [vmem:[#allocation2 + $0x18] sm:$0xff]  ;;  %v87_v48 = vunpack.c.h.bf16 %v1200_v17  ;;  %v74_v16 = vunpack.c.l.bf16 %v1174_v4  ;;  %v90_v17 = vunpack.c.l.bf16 %v1208_v21  ;;  %p1099_p6 = pnand %p1098_p5, %p1092_p2 }
  0x2c   :  { %215 = vmatpush1.bf16.msra.mxu0 %v992_v10  ;;  %1016 = vmatpush1.bf16.msra.mxu1 %v992_v10  ;;  %v1258_v40 = vld [vmem:[#allocation2 + $0x38] sm:$0xff]  ;;  %v72_v10 = vunpack.c.l.bf16 %v1172_v3 }
  0x2d   :  { %216 = vmatprep.subr.bf16.mxu0 %v995_v11  ;;  %1009 = vmatprep.subr.bf16.mxu1 %v995_v11  ;;  %v88_v11 = vunpack.c.l.bf16 %v1206_v20 }
  0x30   :  { %217 = vmatpush1.bf16.msra.mxu0 %v994_v14  ;;  %1017 = vmatpush1.bf16.msra.mxu1 %v994_v14  ;;  %v73_v14 = vunpack.c.h.bf16 %v1172_v3 }
  0x31   :  { %218 = vmatprep.subr.bf16.mxu0 %v997_v15  ;;  %1010 = vmatprep.subr.bf16.mxu1 %v997_v15  ;;  %v89_v15 = vunpack.c.h.bf16 %v1206_v20 }
  0x34   :  { %219 = vmatpush1.bf16.msra.mxu0 %v996_v18  ;;  %1018 = vmatpush1.bf16.msra.mxu1 %v996_v18  ;;  %v75_v18 = vunpack.c.h.bf16 %v1174_v4 }
  0x35   :  { %220 = vmatprep.subr.bf16.mxu0 %v999_v19  ;;  %1011 = vmatprep.subr.bf16.mxu1 %v999_v19  ;;  %v91_v19 = vunpack.c.h.bf16 %v1208_v21 }
  0x38   :  { %221 = vmatpush1.bf16.msra.mxu0 %v998_v22  ;;  %1019 = vmatpush1.bf16.msra.mxu1 %v998_v22 }
  0x39   :  { %222 = vmatprep.subr.bf16.mxu0 %v1001_v23  ;;  %1012 = vmatprep.subr.bf16.mxu1 %v1001_v23 }
  0x3c   :  { %223 = vmatpush1.bf16.msra.mxu0 %v1000_v26  ;;  %1020 = vmatpush1.bf16.msra.mxu1 %v1000_v26 }
  0x3d   :  { %224 = vmatprep.subr.bf16.mxu0 %v1003_v27  ;;  %1013 = vmatprep.subr.bf16.mxu1 %v1003_v27 }
  0x40   :  { %225 = vmatpush1.bf16.msra.mxu0 %v1002_v30  ;;  %1021 = vmatpush1.bf16.msra.mxu1 %v1002_v30 }
  0x41   :  { %226 = vmatprep.subr.bf16.mxu0 %v1005_v31  ;;  %1014 = vmatprep.subr.bf16.mxu1 %v1005_v31 }
  0x44   :  { %227 = vmatpush1.bf16.msra.mxu0 %v1004_v32  ;;  %1022 = vmatpush1.bf16.msra.mxu1 %v1004_v32 }
  0x47   :  { %245 = vmatmul.mubr.bf16.vlgmr.msra.gmra.mrb[0].mxu0 %v1232_v33  ;;  %285 = vmatmul.mubr.bf16.vlgmr.msra.gmra.mrb[0].mxu1 %v1234_v34 }
  0x48   :  { %254 = vmatprep.mubr.bf16.mxu0 %v1577_v0  ;;  %294 = vmatprep.mubr.bf16.mxu1 %v1577_v0 }
  0x4f   :  { %255 = vmatmul.mubr.bf16.gmra.mrb[4].mxu0 %v1240_v35  ;;  %295 = vmatmul.mubr.bf16.gmra.mrb[4].mxu1 %v1242_v36 }
  0x50   :  { %264 = vmatprep.mubr.bf16.mxu0 %v1577_v0  ;;  %304 = vmatprep.mubr.bf16.mxu1 %v1577_v0 }
  0x57   :  { %265 = vmatmul.mubr.bf16.gmra.mrb[8].mxu0 %v1248_v37  ;;  %305 = vmatmul.mubr.bf16.gmra.mrb[8].mxu1 %v1250_v38 }
  0x58   :  { %274 = vmatprep.mubr.bf16.mxu0 %v1577_v0  ;;  %314 = vmatprep.mubr.bf16.mxu1 %v1577_v0 }
  0x5f   :  { %275 = vmatmul.mubr.bf16.gmra.mrb[12].mxu0 %v1256_v39  ;;  %315 = vmatmul.mubr.bf16.gmra.mrb[12].mxu1 %v1258_v40 }
  0x60   :  { %469 = vmatprep.mubr.bf16.mxu1 %v1577_v0  ;;  %694 = vmatprep.mubr.bf16.mxu0 %v1577_v0 }
 0x11a   :  { %v246_v49 = vpop.f32.mrb[0].mxu0  ;;  %v1272_v50 = vpop.f32.mrb[0].mxu1 }
 0x11b   :  { %v1274_v51 = vadd.f32 %v246_v49, %v68_v41  ;;  %v248_v52 = vpop.f32.mrb[1].mxu0  ;;  %v1277_v53 = vadd.f32 %v1272_v50, %v84_v42  ;;  %v1279_v54 = vpop.f32.mrb[1].mxu1 }
 0x11c   :  { %v1281_v55 = vadd.f32 %v248_v52, %v69_v43  ;;  %v250_v56 = vpop.f32.mrb[2].mxu0  ;;  %v1284_v57 = vadd.f32 %v1279_v54, %v85_v44  ;;  %v1286_v58 = vpop.f32.mrb[2].mxu1 }
 0x11d   :  { %v1288_v59 = vadd.f32 %v250_v56, %v70_v45  ;;  %v421_v60 = vpack.c.bf16 %v250_v56, %v246_v49  ;;  %v252_v61 = vpop.f32.mrb[3].mxu0  ;;  %v1291_v62 = vadd.f32 %v1286_v58, %v86_v46  ;;  %v1295_v1 = vpop.f32.mrb[3].mxu1  ;;  %v92_v56 = vunpack.c.l.bf16 %v1214_v24 }
 0x11e   :  { %v1297_v2 = vadd.f32 %v252_v61, %v71_v47  ;;  %v422_v5 = vpack.c.bf16 %v252_v61, %v248_v52  ;;  %v1300_v6 = vadd.f32 %v1295_v1, %v87_v48  ;;  %v76_v52 = vunpack.c.l.bf16 %v1182_v8 }
 0x11f   :  { %v93_v61 = vunpack.c.h.bf16 %v1214_v24 }
 0x120   :  { %437 = vmatprep.subr.bf16.mxu1 %v422_v5  ;;  %v78_v5 = vunpack.c.l.bf16 %v1184_v9 }
 0x121   :  { %438 = vmatpush1.bf16.msra.mxu1 %v421_v60  ;;  %v77_v60 = vunpack.c.h.bf16 %v1182_v8 }
 0x122   :  { %v256_v22 = vpop.f32.mrb[4].mxu0  ;;  %v1312_v23 = vpop.f32.mrb[4].mxu1 }
 0x123   :  { %v1314_v26 = vadd.f32 %v256_v22, %v72_v10  ;;  %v258_v27 = vpop.f32.mrb[5].mxu0  ;;  %v1317_v3 = vadd.f32 %v1312_v23, %v88_v11  ;;  %v1319_v20 = vpop.f32.mrb[5].mxu1  ;;  %v94_v10 = vunpack.c.l.bf16 %v1216_v25  ;;  %v79_v11 = vunpack.c.h.bf16 %v1184_v9 }
 0x124   :  { %v1321_v30 = vadd.f32 %v258_v27, %v73_v14  ;;  %v260_v31 = vpop.f32.mrb[6].mxu0  ;;  %v1324_v32 = vadd.f32 %v1319_v20, %v89_v15  ;;  %v1326_v4 = vpop.f32.mrb[6].mxu1  ;;  %v95_v14 = vunpack.c.h.bf16 %v1216_v25 }
 0x125   :  { %v1328_v21 = vadd.f32 %v260_v31, %v74_v16  ;;  %v423_v41 = vpack.c.bf16 %v260_v31, %v256_v22  ;;  %v262_v42 = vpop.f32.mrb[7].mxu0  ;;  %v1331_v43 = vadd.f32 %v1326_v4, %v90_v17  ;;  %v1335_v45 = vpop.f32.mrb[7].mxu1 }
 0x126   :  { %v1337_v46 = vadd.f32 %v262_v42, %v75_v18  ;;  %v424_v47 = vpack.c.bf16 %v262_v42, %v258_v27  ;;  %v1340_v48 = vadd.f32 %v1335_v45, %v91_v19 }
 0x128   :  { %439 = vmatprep.subr.bf16.mxu1 %v424_v47 }
 0x129   :  { %440 = vmatpush1.bf16.msra.mxu1 %v423_v41 }
 0x12a   :  { %v266_v15 = vpop.f32.mrb[8].mxu0  ;;  %v306_v16 = vpop.f32.mrb[8].mxu1 }
 0x12b   :  { %v1352_v17 = vadd.f32 %v266_v15, %v76_v52  ;;  %v268_v18 = vpop.f32.mrb[9].mxu0  ;;  %v1354_v19 = vadd.f32 %v306_v16, %v92_v56  ;;  %v308_v8 = vpop.f32.mrb[9].mxu1 }
 0x12c   :  { %v1356_v22 = vadd.f32 %v268_v18, %v77_v60  ;;  %v270_v24 = vpop.f32.mrb[10].mxu0  ;;  %v1358_v27 = vadd.f32 %v308_v8, %v93_v61  ;;  %v310_v31 = vpop.f32.mrb[10].mxu1  ;;  %v80_v60 = vunpack.c.l.bf16 %v1190_v12  ;;  %v96_v61 = vunpack.c.l.bf16 %v1222_v28 }
 0x12d   :  { %v1360_v42 = vadd.f32 %v270_v24, %v78_v5  ;;  %v425_v41 = vpack.c.bf16 %v270_v24, %v266_v15  ;;  %v272_v9 = vpop.f32.mrb[11].mxu0  ;;  %v1362_v47 = vadd.f32 %v310_v31, %v94_v10  ;;  %v433_v25 = vpack.c.bf16 %v310_v31, %v306_v16  ;;  %v312_v0 = vpop.f32.mrb[11].mxu1 }
 0x12e   :  { %1579 = vst [vmem:[#allocation15_spill] sm:$0xff] %v1358_v27  ;;  %v1364_v52 = vadd.f32 %v272_v9, %v79_v11  ;;  %v426_v44 = vpack.c.bf16 %v272_v9, %v268_v18  ;;  %v1366_v56 = vadd.f32 %v312_v0, %v95_v14  ;;  %v434_v49 = vpack.c.bf16 %v312_v0, %v308_v8 }
 0x12f   :  { %1580 = vst [vmem:[#allocation16_spill] sm:$0xff] %v1362_v47  ;;  %v97_v5 = vunpack.c.h.bf16 %v1222_v28  ;;  %v82_v10 = vunpack.c.l.bf16 %v1192_v13  ;;  %v98_v15 = vunpack.c.l.bf16 %v1224_v29  ;;  %v83_v11 = vunpack.c.h.bf16 %v1192_v13 }
 0x130   :  { %1581 = vst [vmem:[#allocation17_spill] sm:$0xff] %v1366_v56  ;;  %441 = vmatprep.subr.bf16.mxu1 %v426_v44  ;;  %v99_v14 = vunpack.c.h.bf16 %v1224_v29 }
 0x131   :  { %442 = vmatpush1.bf16.msra.mxu1 %v425_v41 }
 0x132   :  { %v276_v16 = vpop.f32.mrb[12].mxu0  ;;  %v316_v0 = vpop.f32.mrb[12].mxu1 }
 0x133   :  { %v1376_v18 = vadd.f32 %v276_v16, %v80_v60  ;;  %v278_v8 = vpop.f32.mrb[13].mxu0  ;;  %v1378_v24 = vadd.f32 %v316_v0, %v96_v61  ;;  %v318_v12 = vpop.f32.mrb[13].mxu1 }
 0x134   :  { %v1380_v31 = vadd.f32 %v278_v8, %v81_v63  ;;  %v280_v28 = vpop.f32.mrb[14].mxu0  ;;  %v1382_v44 = vadd.f32 %v318_v12, %v97_v5  ;;  %v320_v9 = vpop.f32.mrb[14].mxu1  ;;  %v1583_v63 = vpack.c.bf16 %v1295_v1, %v1279_v54  ;;  %v1584_v5 = vpack.c.bf16 %v1286_v58, %v1272_v50 }
 0x135   :  { %1582 = vst [vmem:[#allocation18_spill] sm:$0xff] %v1378_v24  ;;  %v1384_v7 = vadd.f32 %v280_v28, %v82_v10  ;;  %v427_v41 = vpack.c.bf16 %v280_v28, %v276_v16  ;;  %v282_v13 = vpop.f32.mrb[15].mxu0  ;;  %v1386_v56 = vadd.f32 %v320_v9, %v98_v15  ;;  %v435_v29 = vpack.c.bf16 %v320_v9, %v316_v0  ;;  %v322_v47 = vpop.f32.mrb[15].mxu1 }
 0x136   :  { %v1388_v60 = vadd.f32 %v282_v13, %v83_v11  ;;  %v428_v27 = vpack.c.bf16 %v282_v13, %v278_v8  ;;  %v1390_v61 = vadd.f32 %v322_v47, %v99_v14  ;;  %v436_v24 = vpack.c.bf16 %v322_v47, %v318_v12 }
 0x137   :  { %v1585_v10 = vpack.c.bf16 %v1335_v45, %v1319_v20  ;;  %v1586_v15 = vpack.c.bf16 %v1326_v4, %v1312_v23  ;;  %v1587_v54 = vmov 0  }
 0x138   :  { %443 = vmatprep.subr.bf16.mxu1 %v428_v27 }
 0x139   :  { %444 = vmatpush1.bf16.msra.mxu1 %v427_v41 }
 0x13a   :  { %445 = vmatprep.subr.bf16.mxu1 %v1583_v63 }
 0x13d   :  { %446 = vmatpush1.bf16.msra.mxu1 %v1584_v5 }
 0x13e   :  { %447 = vmatprep.subr.bf16.mxu1 %v1585_v10 }
 0x141   :  { %448 = vmatpush1.bf16.msra.mxu1 %v1586_v15 }
 0x142   :  { %449 = vmatprep.subr.bf16.mxu1 %v434_v49 }
 0x145   :  { %450 = vmatpush1.bf16.msra.mxu1 %v433_v25 }
 0x146   :  { %451 = vmatprep.subr.bf16.mxu1 %v436_v24 }
 0x149   :  { %452 = vmatpush1.bf16.msra.mxu1 %v435_v29 }
 0x14c   :  { %470 = vmatmul.mubr.bf16.vlgmr.msra.gmra.mrb[16].mxu1 %v1232_v33 }
 0x14d   :  { %479 = vmatprep.mubr.bf16.mxu1 %v1587_v54 }
 0x154   :  { %480 = vmatmul.mubr.bf16.gmra.mrb[20].mxu1 %v1240_v35 }
 0x155   :  { %489 = vmatprep.mubr.bf16.mxu1 %v1587_v54 }
 0x15c   :  { %490 = vmatmul.mubr.bf16.gmra.mrb[24].mxu1 %v1248_v37 }
 0x15d   :  { %499 = vmatprep.mubr.bf16.mxu1 %v1587_v54 }
 0x164   :  { %500 = vmatmul.mubr.bf16.gmra.mrb[28].mxu1 %v1256_v39 }
 0x165   :  { %509 = vmatprep.mubr.bf16.mxu1 %v1587_v54 }
 0x16c   :  { %510 = vmatmul.mubr.bf16.gmra.mrb[32].mxu1 %v1234_v34 }
 0x16d   :  { %519 = vmatprep.mubr.bf16.mxu1 %v1587_v54 }
 0x174   :  { %520 = vmatmul.mubr.bf16.gmra.mrb[36].mxu1 %v1242_v36 }
 0x175   :  { %529 = vmatprep.mubr.bf16.mxu1 %v1587_v54 }
 0x17c   :  { %530 = vmatmul.mubr.bf16.gmra.mrb[40].mxu1 %v1250_v38 }
 0x17d   :  { %539 = vmatprep.mubr.bf16.mxu1 %v1587_v54 }
 0x184   :  { %540 = vmatmul.mubr.bf16.gmra.mrb[44].mxu1 %v1258_v40 }
 0x21f   :  { %v471_v50 = vpop.f32.mrb[16].mxu1 }
 0x220   :  { %v1420_v58 = vadd.f32 %v471_v50, %v1274_v51  ;;  %v473_v1 = vpop.f32.mrb[17].mxu1 }
 0x221   :  { %v1423_v23 = vadd.f32 %v473_v1, %v1281_v55  ;;  %v475_v20 = vpop.f32.mrb[18].mxu1 }
 0x222   :  { %v1426_v4 = vadd.f32 %v475_v20, %v1288_v59  ;;  %v646_v45 = vpack.c.bf16 %v475_v20, %v471_v50  ;;  %v477_v49 = vpop.f32.mrb[19].mxu1 }
 0x223   :  { %v1429_v27 = vadd.f32 %v477_v49, %v1297_v2  ;;  %v647_v47 = vpack.c.bf16 %v477_v49, %v473_v1 }
 0x225   :  { %662 = vmatprep.subr.bf16.mxu0 %v647_v47 }
 0x226   :  { %663 = vmatpush1.bf16.msra.mxu0 %v646_v45 }
 0x227   :  { %v481_v25 = vpop.f32.mrb[20].mxu1 }
 0x228   :  { %v1432_v51 = vadd.f32 %v481_v25, %v1314_v26  ;;  %v483_v11 = vpop.f32.mrb[21].mxu1 }
 0x229   :  { %v1435_v55 = vadd.f32 %v483_v11, %v1321_v30  ;;  %v485_v14 = vpop.f32.mrb[22].mxu1 }
 0x22a   :  { %v1438_v59 = vadd.f32 %v485_v14, %v1328_v21  ;;  %v648_v16 = vpack.c.bf16 %v485_v14, %v481_v25  ;;  %v487_v0 = vpop.f32.mrb[23].mxu1 }
 0x22b   :  { %v1441_v2 = vadd.f32 %v487_v0, %v1337_v46  ;;  %v649_v8 = vpack.c.bf16 %v487_v0, %v483_v11 }
 0x22d   :  { %664 = vmatprep.subr.bf16.mxu0 %v649_v8 }
 0x22e   :  { %665 = vmatpush1.bf16.msra.mxu0 %v648_v16 }
 0x22f   :  { %v491_v24 = vpop.f32.mrb[24].mxu1 }
 0x230   :  { %v1444_v26 = vadd.f32 %v491_v24, %v1352_v17  ;;  %v493_v12 = vpop.f32.mrb[25].mxu1 }
 0x231   :  { %v1447_v30 = vadd.f32 %v493_v12, %v1356_v22  ;;  %v495_v28 = vpop.f32.mrb[26].mxu1 }
 0x232   :  { %v1450_v21 = vadd.f32 %v495_v28, %v1360_v42  ;;  %v650_v9 = vpack.c.bf16 %v495_v28, %v491_v24  ;;  %v497_v41 = vpop.f32.mrb[27].mxu1 }
 0x233   :  { %v1453_v46 = vadd.f32 %v497_v41, %v1364_v52  ;;  %v651_v13 = vpack.c.bf16 %v497_v41, %v493_v12 }
 0x235   :  { %666 = vmatprep.subr.bf16.mxu0 %v651_v13  ;;  %v1589_v13 = vld [vmem:[#allocation16_spill] sm:$0xff] }
 0x236   :  { %667 = vmatpush1.bf16.msra.mxu0 %v650_v9  ;;  %v1588_v9 = vld [vmem:[#allocation15_spill] sm:$0xff] }
 0x237   :  { %v501_v29 = vpop.f32.mrb[28].mxu1 }
 0x238   :  { %v1456_v17 = vadd.f32 %v501_v29, %v1376_v18  ;;  %v503_v63 = vpop.f32.mrb[29].mxu1 }
 0x239   :  { %v1459_v22 = vadd.f32 %v503_v63, %v1380_v31  ;;  %v505_v5 = vpop.f32.mrb[30].mxu1 }
 0x23a   :  { %v1462_v42 = vadd.f32 %v505_v5, %v1384_v7  ;;  %v652_v10 = vpack.c.bf16 %v505_v5, %v501_v29  ;;  %v507_v15 = vpop.f32.mrb[31].mxu1  ;;  %v1590_v5 = vld [vmem:[#allocation17_spill] sm:$0xff] }
 0x23b   :  { %v1465_v52 = vadd.f32 %v507_v15, %v1388_v60  ;;  %v653_v50 = vpack.c.bf16 %v507_v15, %v503_v63 }
 0x23d   :  { %668 = vmatprep.subr.bf16.mxu0 %v653_v50  ;;  %v1591_v50 = vld [vmem:[#allocation18_spill] sm:$0xff] }
 0x23e   :  { %669 = vmatpush1.bf16.msra.mxu0 %v652_v10 }
 0x23f   :  { %v511_v1 = vpop.f32.mrb[32].mxu1 }
 0x240   :  { %v1468_v18 = vadd.f32 %v511_v1, %v1277_v53  ;;  %v513_v20 = vpop.f32.mrb[33].mxu1 }
 0x241   :  { %v1471_v31 = vadd.f32 %v513_v20, %v1284_v57  ;;  %v515_v45 = vpop.f32.mrb[34].mxu1 }
 0x242   :  { %v1474_v7 = vadd.f32 %v515_v45, %v1291_v62  ;;  %v654_v49 = vpack.c.bf16 %v515_v45, %v511_v1  ;;  %v517_v47 = vpop.f32.mrb[35].mxu1 }
 0x243   :  { %v1477_v60 = vadd.f32 %v517_v47, %v1300_v6  ;;  %v655_v25 = vpack.c.bf16 %v517_v47, %v513_v20 }
 0x245   :  { %670 = vmatprep.subr.bf16.mxu0 %v655_v25 }
 0x246   :  { %671 = vmatpush1.bf16.msra.mxu0 %v654_v49 }
 0x247   :  { %v521_v11 = vpop.f32.mrb[36].mxu1 }
 0x248   :  { %v1480_v53 = vadd.f32 %v521_v11, %v1317_v3  ;;  %v523_v14 = vpop.f32.mrb[37].mxu1 }
 0x249   :  { %v1483_v57 = vadd.f32 %v523_v14, %v1324_v32  ;;  %v525_v16 = vpop.f32.mrb[38].mxu1 }
 0x24a   :  { %v1486_v62 = vadd.f32 %v525_v16, %v1331_v43  ;;  %v656_v0 = vpack.c.bf16 %v525_v16, %v521_v11  ;;  %v527_v8 = vpop.f32.mrb[39].mxu1 }
 0x24b   :  { %v1489_v6 = vadd.f32 %v527_v8, %v1340_v48  ;;  %v657_v24 = vpack.c.bf16 %v527_v8, %v523_v14 }
 0x24d   :  { %672 = vmatprep.subr.bf16.mxu0 %v657_v24 }
 0x24e   :  { %673 = vmatpush1.bf16.msra.mxu0 %v656_v0 }
 0x24f   :  { %v531_v12 = vpop.f32.mrb[40].mxu1 }
 0x250   :  { %v1492_v3 = vadd.f32 %v531_v12, %v1354_v19  ;;  %v533_v28 = vpop.f32.mrb[41].mxu1 }
 0x251   :  { %v1495_v32 = vadd.f32 %v533_v28, %v1588_v9  ;;  %v535_v41 = vpop.f32.mrb[42].mxu1 }
 0x252   :  { %v1498_v43 = vadd.f32 %v535_v41, %v1589_v13  ;;  %v658_v29 = vpack.c.bf16 %v535_v41, %v531_v12  ;;  %v537_v63 = vpop.f32.mrb[43].mxu1 }
 0x253   :  { %v1501_v48 = vadd.f32 %v537_v63, %v1590_v5  ;;  %v659_v10 = vpack.c.bf16 %v537_v63, %v533_v28 }
 0x255   :  { %674 = vmatprep.subr.bf16.mxu0 %v659_v10 }
 0x256   :  { %675 = vmatpush1.bf16.msra.mxu0 %v658_v29 }
 0x257   :  { %v541_v15 = vpop.f32.mrb[44].mxu1 }
 0x258   :  { %v1504_v19 = vadd.f32 %v541_v15, %v1591_v50  ;;  %v543_v1 = vpop.f32.mrb[45].mxu1 }
 0x259   :  { %v1507_v20 = vadd.f32 %v543_v1, %v1382_v44  ;;  %v545_v45 = vpop.f32.mrb[46].mxu1 }
 0x25a   :  { %v1510_v49 = vadd.f32 %v545_v45, %v1386_v56  ;;  %v660_v47 = vpack.c.bf16 %v545_v45, %v541_v15  ;;  %v547_v25 = vpop.f32.mrb[47].mxu1 }
 0x25b   :  { %v1513_v11 = vadd.f32 %v547_v25, %v1390_v61  ;;  %v661_v14 = vpack.c.bf16 %v547_v25, %v543_v1 }
 0x25d   :  { %676 = vmatprep.subr.bf16.mxu0 %v661_v14 }
 0x25e   :  { %677 = vmatpush1.bf16.msra.mxu0 %v660_v47 }
 0x261   :  { %695 = vmatmul.mubr.bf16.vlgmr.msra.gmra.mrb[16].mxu0 %v1232_v33 }
 0x262   :  { %704 = vmatprep.mubr.bf16.mxu0 %v1587_v54 }
 0x269   :  { %705 = vmatmul.mubr.bf16.gmra.mrb[20].mxu0 %v1240_v35 }
 0x26a   :  { %714 = vmatprep.mubr.bf16.mxu0 %v1587_v54 }
 0x271   :  { %715 = vmatmul.mubr.bf16.gmra.mrb[24].mxu0 %v1248_v37 }
 0x272   :  { %724 = vmatprep.mubr.bf16.mxu0 %v1587_v54 }
 0x279   :  { %725 = vmatmul.mubr.bf16.gmra.mrb[28].mxu0 %v1256_v39 }
 0x27a   :  { %734 = vmatprep.mubr.bf16.mxu0 %v1587_v54 }
 0x281   :  { %735 = vmatmul.mubr.bf16.gmra.mrb[32].mxu0 %v1234_v34 }
 0x282   :  { %744 = vmatprep.mubr.bf16.mxu0 %v1587_v54 }
 0x289   :  { %745 = vmatmul.mubr.bf16.gmra.mrb[36].mxu0 %v1242_v36 }
 0x28a   :  { %754 = vmatprep.mubr.bf16.mxu0 %v1587_v54 }
 0x291   :  { %755 = vmatmul.mubr.bf16.gmra.mrb[40].mxu0 %v1250_v38 }
 0x292   :  { %764 = vmatprep.mubr.bf16.mxu0 %v1587_v54 }
 0x299   :  { %765 = vmatmul.mubr.bf16.gmra.mrb[44].mxu0 %v1258_v40 }
 0x334   :  { %v696_v33 = vpop.f32.mrb[16].mxu0 }
 0x335   :  { %v807_v35 = vadd.f32 %v696_v33, %v1420_v58  ;;  %v698_v37 = vpop.f32.mrb[17].mxu0 }
 0x336   :  { %v808_v39 = vadd.f32 %v698_v37, %v1423_v23  ;;  %v700_v56 = vpop.f32.mrb[18].mxu0 }
 0x337   :  { %v903_v34 = vmul.f32 0.25, %v807_v35  ;;  %v809_v44 = vadd.f32 %v700_v56, %v1426_v4  ;;  %v702_v61 = vpop.f32.mrb[19].mxu0 }
 0x338   :  { %v904_v36 = vmul.f32 0.25, %v808_v39  ;;  %v810_v16 = vadd.f32 %v702_v61, %v1429_v27 }
 0x339   :  { %935 = vst [vmem:[#allocation7] sm:$0xff] %v903_v34  ;;  %v905_v38 = vmul.f32 0.25, %v809_v44 }
 0x33a   :  { %936 = vst [vmem:[#allocation7 + $0x8] sm:$0xff] %v904_v36  ;;  %v906_v54 = vmul.f32 0.25, %v810_v16 }
 0x33b   :  { %937 = vst [vmem:[#allocation7 + $0x10] sm:$0xff] %v905_v38 }
 0x33c   :  { %938 = vst [vmem:[#allocation7 + $0x18] sm:$0xff] %v906_v54  ;;  %v706_v40 = vpop.f32.mrb[20].mxu0 }
 0x33d   :  { %v811_v58 = vadd.f32 %v706_v40, %v1432_v51  ;;  %v708_v0 = vpop.f32.mrb[21].mxu0 }
 0x33e   :  { %v812_v23 = vadd.f32 %v708_v0, %v1435_v55  ;;  %v710_v8 = vpop.f32.mrb[22].mxu0 }
 0x33f   :  { %v907_v24 = vmul.f32 0.25, %v811_v58  ;;  %v813_v4 = vadd.f32 %v710_v8, %v1438_v59  ;;  %v712_v12 = vpop.f32.mrb[23].mxu0 }
 0x340   :  { %v908_v28 = vmul.f32 0.25, %v812_v23  ;;  %v814_v27 = vadd.f32 %v712_v12, %v1441_v2 }
 0x341   :  { %939 = vst [vmem:[#allocation7 + $0x20] sm:$0xff] %v907_v24  ;;  %v909_v9 = vmul.f32 0.25, %v813_v4 }
 0x342   :  { %940 = vst [vmem:[#allocation7 + $0x28] sm:$0xff] %v908_v28  ;;  %v910_v41 = vmul.f32 0.25, %v814_v27 }
 0x343   :  { %941 = vst [vmem:[#allocation7 + $0x30] sm:$0xff] %v909_v9 }
 0x344   :  { %942 = vst [vmem:[#allocation7 + $0x38] sm:$0xff] %v910_v41  ;;  %v716_v13 = vpop.f32.mrb[24].mxu0 }
 0x345   :  { %v815_v51 = vadd.f32 %v716_v13, %v1444_v26  ;;  %v718_v29 = vpop.f32.mrb[25].mxu0 }
 0x346   :  { %v816_v55 = vadd.f32 %v718_v29, %v1447_v30  ;;  %v720_v63 = vpop.f32.mrb[26].mxu0 }
 0x347   :  { %v911_v5 = vmul.f32 0.25, %v815_v51  ;;  %v817_v59 = vadd.f32 %v720_v63, %v1450_v21  ;;  %v722_v10 = vpop.f32.mrb[27].mxu0 }
 0x348   :  { %v912_v15 = vmul.f32 0.25, %v816_v55  ;;  %v818_v2 = vadd.f32 %v722_v10, %v1453_v46 }
 0x349   :  { %943 = vst [vmem:[#allocation7 + $0x40] sm:$0xff] %v911_v5  ;;  %v913_v50 = vmul.f32 0.25, %v817_v59 }
 0x34a   :  { %944 = vst [vmem:[#allocation7 + $0x48] sm:$0xff] %v912_v15  ;;  %v914_v1 = vmul.f32 0.25, %v818_v2 }
 0x34b   :  { %945 = vst [vmem:[#allocation7 + $0x50] sm:$0xff] %v913_v50 }
 0x34c   :  { %946 = vst [vmem:[#allocation7 + $0x58] sm:$0xff] %v914_v1  ;;  %v726_v45 = vpop.f32.mrb[28].mxu0 }
 0x34d   :  { %v819_v26 = vadd.f32 %v726_v45, %v1456_v17  ;;  %v728_v47 = vpop.f32.mrb[29].mxu0 }
 0x34e   :  { %v820_v30 = vadd.f32 %v728_v47, %v1459_v22  ;;  %v730_v25 = vpop.f32.mrb[30].mxu0 }
 0x34f   :  { %v915_v14 = vmul.f32 0.25, %v819_v26  ;;  %v821_v21 = vadd.f32 %v730_v25, %v1462_v42  ;;  %v732_v33 = vpop.f32.mrb[31].mxu0 }
 0x350   :  { %v916_v35 = vmul.f32 0.25, %v820_v30  ;;  %v822_v46 = vadd.f32 %v732_v33, %v1465_v52 }
 0x351   :  { %947 = vst [vmem:[#allocation7 + $0x60] sm:$0xff] %v915_v14  ;;  %v917_v37 = vmul.f32 0.25, %v821_v21 }
 0x352   :  { %948 = vst [vmem:[#allocation7 + $0x68] sm:$0xff] %v916_v35  ;;  %v918_v39 = vmul.f32 0.25, %v822_v46 }
 0x353   :  { %949 = vst [vmem:[#allocation7 + $0x70] sm:$0xff] %v917_v37 }
 0x354   :  { %950 = vst [vmem:[#allocation7 + $0x78] sm:$0xff] %v918_v39  ;;  %v736_v56 = vpop.f32.mrb[32].mxu0 }
 0x355   :  { %v823_v17 = vadd.f32 %v736_v56, %v1468_v18  ;;  %v738_v34 = vpop.f32.mrb[33].mxu0 }
 0x356   :  { %v824_v22 = vadd.f32 %v738_v34, %v1471_v31  ;;  %v740_v44 = vpop.f32.mrb[34].mxu0 }
 0x357   :  { %v919_v61 = vmul.f32 0.25, %v823_v17  ;;  %v825_v42 = vadd.f32 %v740_v44, %v1474_v7  ;;  %v742_v36 = vpop.f32.mrb[35].mxu0 }
 0x358   :  { %v920_v16 = vmul.f32 0.25, %v824_v22  ;;  %v826_v52 = vadd.f32 %v742_v36, %v1477_v60 }
 0x359   :  { %951 = vst [vmem:[#allocation7 + $0x80] sm:$0xff] %v919_v61  ;;  %v921_v38 = vmul.f32 0.25, %v825_v42 }
 0x35a   :  { %952 = vst [vmem:[#allocation7 + $0x88] sm:$0xff] %v920_v16  ;;  %v922_v54 = vmul.f32 0.25, %v826_v52 }
 0x35b   :  { %953 = vst [vmem:[#allocation7 + $0x90] sm:$0xff] %v921_v38 }
 0x35c   :  { %954 = vst [vmem:[#allocation7 + $0x98] sm:$0xff] %v922_v54  ;;  %v746_v40 = vpop.f32.mrb[36].mxu0 }
 0x35d   :  { %v827_v18 = vadd.f32 %v746_v40, %v1480_v53  ;;  %v748_v58 = vpop.f32.mrb[37].mxu0 }
 0x35e   :  { %v828_v31 = vadd.f32 %v748_v58, %v1483_v57  ;;  %v750_v0 = vpop.f32.mrb[38].mxu0 }
 0x35f   :  { %v923_v23 = vmul.f32 0.25, %v827_v18  ;;  %v829_v7 = vadd.f32 %v750_v0, %v1486_v62  ;;  %v752_v8 = vpop.f32.mrb[39].mxu0 }
 0x360   :  { %v924_v24 = vmul.f32 0.25, %v828_v31  ;;  %v830_v60 = vadd.f32 %v752_v8, %v1489_v6 }
 0x361   :  { %955 = vst [vmem:[#allocation7 + $0xa0] sm:$0xff] %v923_v23  ;;  %v925_v4 = vmul.f32 0.25, %v829_v7 }
 0x362   :  { %956 = vst [vmem:[#allocation7 + $0xa8] sm:$0xff] %v924_v24  ;;  %v926_v12 = vmul.f32 0.25, %v830_v60 }
 0x363   :  { %957 = vst [vmem:[#allocation7 + $0xb0] sm:$0xff] %v925_v4 }
 0x364   :  { %958 = vst [vmem:[#allocation7 + $0xb8] sm:$0xff] %v926_v12  ;;  %v756_v28 = vpop.f32.mrb[40].mxu0 }
 0x365   :  { %v831_v53 = vadd.f32 %v756_v28, %v1492_v3  ;;  %v758_v27 = vpop.f32.mrb[41].mxu0 }
 0x366   :  { %v832_v57 = vadd.f32 %v758_v27, %v1495_v32  ;;  %v760_v9 = vpop.f32.mrb[42].mxu0 }
 0x367   :  { %v927_v41 = vmul.f32 0.25, %v831_v53  ;;  %v833_v62 = vadd.f32 %v760_v9, %v1498_v43  ;;  %v762_v13 = vpop.f32.mrb[43].mxu0 }
 0x368   :  { %v928_v51 = vmul.f32 0.25, %v832_v57  ;;  %v834_v6 = vadd.f32 %v762_v13, %v1501_v48 }
 0x369   :  { %959 = vst [vmem:[#allocation7 + $0xc0] sm:$0xff] %v927_v41  ;;  %v929_v29 = vmul.f32 0.25, %v833_v62 }
 0x36a   :  { %960 = vst [vmem:[#allocation7 + $0xc8] sm:$0xff] %v928_v51  ;;  %v930_v55 = vmul.f32 0.25, %v834_v6 }
 0x36b   :  { %961 = vst [vmem:[#allocation7 + $0xd0] sm:$0xff] %v929_v29 }
 0x36c   :  { %962 = vst [vmem:[#allocation7 + $0xd8] sm:$0xff] %v930_v55  ;;  %v766_v63 = vpop.f32.mrb[44].mxu0 }
 0x36d   :  { %v835_v3 = vadd.f32 %v766_v63, %v1504_v19  ;;  %v768_v5 = vpop.f32.mrb[45].mxu0 }
 0x36e   :  { %v836_v32 = vadd.f32 %v768_v5, %v1507_v20  ;;  %v770_v59 = vpop.f32.mrb[46].mxu0 }
 0x36f   :  { %v931_v43 = vmul.f32 0.25, %v835_v3  ;;  %v837_v10 = vadd.f32 %v770_v59, %v1510_v49  ;;  %v772_v15 = vpop.f32.mrb[47].mxu0 }
 0x370   :  { %v932_v48 = vmul.f32 0.25, %v836_v32  ;;  %v838_v2 = vadd.f32 %v772_v15, %v1513_v11 }
 0x371   :  { %963 = vst [vmem:[#allocation7 + $0xe0] sm:$0xff] %v931_v43  ;;  %v933_v50 = vmul.f32 0.25, %v837_v10 }
 0x372   :  { %964 = vst [vmem:[#allocation7 + $0xe8] sm:$0xff] %v932_v48  ;;  %v934_v1 = vmul.f32 0.25, %v838_v2 }
 0x373   :  { %965 = vst [vmem:[#allocation7 + $0xf0] sm:$0xff] %v933_v50 }
 0x374   :  { %966 = vst [vmem:[#allocation7 + $0xf8] sm:$0xff] %v934_v1 }
 0x375   :  { %1102 = shalt.err (!%p1099_p6)
}
 0x376   :  { %s1103_s10 = scalar_lea.hbm %s1576_s2, 4096 }
 0x377   :  { %p1104_p7 = scmp.ne.s32.totalorder %s1576_s2, %s1103_s10  ;;  %p1107_p8 = scmp.lt.u32.totalorder %s1103_s10, %s1576_s2 }
 0x379   :  { %p1109_p9 = pnand %p1107_p8, %p1104_p7 }
 0x37b   :  { %1112 = shalt.err (!%p1109_p9)
}
 0x37c   :  { %s1125_s15 = smov 256   ;;  %s1126_s16 = smov 16  }
 0x37d   :  { %978 = dma.vmem_to_hbm [thread:$0]  %s973_s6, 4096, %s1576_s2, [#allocation6], %s1125_s15, %s1125_s15, %s1126_s16  }
 0x37e   :  { %1117 = dma.done.wait [#allocation6], 4096  }
 0x37f   :  { %1118 = vsyncadd [#allocation6], 4294963200 }
 0x380   :  { %982 = vsyncpa [#allocation5], 1 }
 0x381   :  { %983 = vsyncpa [#allocation6], 1 }
 0x382   :  { %984 = vsyncmov [#allocation3] }
 0x385   :  { %s985_s19 = vpop.sfrf %984 }
 0x386   :  { %p1006_p10 = scmp.ne.s32.totalorder %s985_s19, 0 }
 0x388   :  { %989 = shalt.err (%p1006_p10)  }

</bundles_post_ra>
